<compile_context>
chip_gen: v7x
topology: tpu7x:2x2x1
jax: 0.10.0
libtpu: 0.0.40
codegen_flags: <defaults>
</compile_context>

<pallas_src>
from functools import partial

import jax
import jax.numpy as jnp
from jax import lax
from jax.experimental import pallas as pl
from jax.experimental.pallas import tpu as pltpu


def _slab_layout(E, D, H, A, O, S, B):
    """Row layout of the packed bf16 weight/mask slab (shared by prep + kernel)."""
    SB, TH = S * B, 3 * H
    r8 = lambda n: -(-n // 8) * 8
    blocks = [
        ('uw',    D,  A),        # U_w^T
        ('hw',    H,  A + TH),   # [W_w^T | W_hh^T]   (A + 3H == 128 for A == H == 32)
        ('wi_y',  E,  TH),       # A_y   = W_combine^T[:E]  @ W_ih^T
        ('wi_c',  D,  TH),       # A_ctx = W_combine^T[E:]  @ W_ih^T
        ('wo',    H,  O),        # W_out^T
        ('sel',   SB, B),        # sel[k, b]   = 1  iff  k %  B == b   (wq row replication)
        ('rep',   S,  SB),       # rep[s, k]   = 1  iff  k // B == s   (attw seq expansion)
        ('bmask', B,  SB),       # bmask[b, k] = 1  iff  k %  B == b   (batch row mask)
    ]
    lay, row = {}, 0
    for name, nr, nc in blocks:
        lay[name] = (row, nr, nc)
        row += r8(nr)
    lanes = -(-max(nc for _, _, nc in blocks) // 128) * 128
    return lay, r8(row), lanes


def _decoder_fused_kernel(enc_ref, y_ref, h_ref, W_ref, b_ref, out_ref,
                          *, S, B, E, D, H, A, O):
    f32, bf16 = jnp.float32, jnp.bfloat16
    SB, TH = S * B, 3 * H
    lay, _, _ = _slab_layout(E, D, H, A, O, S, B)

    def wblk(name):                          # static ref slice -> loads just that window
        r0, nr, nc = lay[name]
        return W_ref[r0:r0 + nr, 0:nc]

    enc = enc_ref[...]                       # (S*B, D) bf16, row k <-> (s=k//B, b=k%B)
    y = y_ref[...]                           # (B, E)  f32
    h = h_ref[...]                           # (B, H)  f32

    # ---------------- off-critical-path dots issued first ----------------
    gi_y = jnp.dot(y.astype(bf16), wblk('wi_y'), preferred_element_type=f32)      # (B, 3H)
    hW = jnp.dot(h.astype(bf16), wblk('hw'), preferred_element_type=f32)          # (B, A+3H)
    wq = hW[:, :A]                                                                  # (B, A)
    gh = hW[:, A:] + b_ref[3:4, 0:TH]                                               # (B, 3H)

    # ---------------- attention scores ----------------
    uh = jnp.dot(enc, wblk('uw'), preferred_element_type=f32)                      # (S*B, A)
    # row-periodic broadcast of wq over the sequence axis via a static selector matmul
    wq_rep = jnp.dot(wblk('sel'), wq.astype(bf16), preferred_element_type=f32)     # (S*B, A)
    wquh = jnp.tanh(uh + wq_rep + b_ref[0:1, 0:A])                                  # (S*B, A)
    # v . wquh contracted over A, lane-dense: flat[0, k] = score of (s=k//B, b=k%B)
    # (v bias dropped: a uniform shift of all scores is softmax-invariant)
    flat = lax.dot_general(b_ref[1:2, 0:A], wquh, (((1,), (1,)), ((), ())),
                           preferred_element_type=f32)                              # (1, S*B)

    # ---------------- PyTorch .view quirk + softmax (nn.Softmax dim=1) ----------------
    # scores.view(B, S) of the s-major flat vector: quirk[i, j] = flat[0, i*S + j]
    quirk = jnp.concatenate([flat[:, i * S:(i + 1) * S] for i in range(B)], axis=0)  # (B, S)
    m = jnp.max(quirk, axis=1, keepdims=True)
    e = jnp.exp(quirk - m)
    attw = e * pl.reciprocal(jnp.sum(e, axis=1, keepdims=True), approx=True)         # (B, S)

    # ---------------- context ----------------
    # context[b, :] = sum_s attw[b, s] * enc[s*B + b, :]  — masked matmul, no transposes
    attw_bf = attw.astype(bf16)
    w_exp = jnp.dot(attw_bf, wblk('rep'), preferred_element_type=f32)               # (B, S*B)
    w_sel = (w_exp * wblk('bmask')).astype(bf16)                                      # exact
    ctx = jnp.dot(w_sel, enc, preferred_element_type=f32)                             # (B, D)

    # ---------------- W_combine (pre-composed) + single-step GRU ----------------
    gi = (gi_y + jnp.dot(ctx.astype(bf16), wblk('wi_c'), preferred_element_type=f32)
          + b_ref[2:3, 0:TH])                                                         # (B, 3H)
    r = jax.nn.sigmoid(gi[:, :H] + gh[:, :H])
    z = jax.nn.sigmoid(gi[:, H:2 * H] + gh[:, H:2 * H])
    n = jnp.tanh(gi[:, 2 * H:] + r * gh[:, 2 * H:])
    h_new = (1.0 - z) * n + z * h                                                     # (B, H) f32

    # ---------------- output projection + log_softmax (dim=1) ----------------
    logits = (jnp.dot(h_new.astype(bf16), wblk('wo'), preferred_element_type=f32)
              + b_ref[4:5, 0:O])
    lm = jnp.max(logits, axis=1, keepdims=True)
    lse = jnp.log(jnp.sum(jnp.exp(logits - lm), axis=1, keepdims=True)) + lm

    # single lane-concatenated output slab: [log_probs | h_new | attention_weights]
    out_ref[...] = jnp.concatenate([logits - lse, h_new, attw], axis=1)


def prepare_params(params, S, B):
    """One-time host-side packing / pre-composition of the Decoder parameters."""
    A, D = params['U_w'].shape
    H = params['W_w'].shape[1]
    E = params['W_combine_w'].shape[1] - D
    O = params['W_out_w'].shape[0]
    SB, TH = S * B, 3 * H

    W_ihT = params['gru_w_ih'].T                       # (H, 3H), gate order r|z|n
    WcT = params['W_combine_w'].T                      # (E+D, H)
    # Fold W_combine into the GRU input gates:  x = [y|ctx] @ Wc^T + bc ;
    # gi = x @ W_ih^T + b_ih  ==>  gi = y @ A_y + ctx @ A_ctx + (bc @ W_ih^T + b_ih)
    A_y = WcT[:E] @ W_ihT                              # (E, 3H)
    A_ctx = WcT[E:] @ W_ihT                            # (D, 3H)
    b_i = params['W_combine_b'] @ W_ihT + params['gru_b_ih']     # (3H,)

    # static selector / mask tensors (hoisted out of the per-call kernel)
    k = jnp.arange(SB)
    sel = (k[:, None] % B == jnp.arange(B)[None, :]).astype(jnp.float32)     # (S*B, B)
    rep = (k[None, :] // B == jnp.arange(S)[:, None]).astype(jnp.float32)    # (S, S*B)
    bmask = (k[None, :] % B == jnp.arange(B)[:, None]).astype(jnp.float32)   # (B, S*B)

    lay, rows, lanes = _slab_layout(E, D, H, A, O, S, B)
    slab = jnp.zeros((rows, lanes), jnp.float32)

    def put(s, name, val):
        r0, nr, nc = lay[name]
        return s.at[r0:r0 + nr, 0:nc].set(val)

    slab = put(slab, 'uw', params['U_w'].T)
    slab = put(slab, 'hw', jnp.concatenate([params['W_w'].T, params['gru_w_hh'].T], axis=1))
    slab = put(slab, 'wi_y', A_y)
    slab = put(slab, 'wi_c', A_ctx)
    slab = put(slab, 'wo', params['W_out_w'].T)
    slab = put(slab, 'sel', sel)
    slab = put(slab, 'rep', rep)
    slab = put(slab, 'bmask', bmask)

    # f32 bias slab: [Ub+Wb | v_w | b_i (W_combine folded) | b_hh | W_out_b]
    bias = jnp.zeros((5, lanes), jnp.float32)
    bias = bias.at[0, :A].set(params['U_b'] + params['W_b'])
    bias = bias.at[1, :A].set(params['v_w'][0])
    bias = bias.at[2, :TH].set(b_i)
    bias = bias.at[3, :TH].set(params['gru_b_hh'])
    bias = bias.at[4, :O].set(params['W_out_b'])

    prepped = {'W': slab.astype(jnp.bfloat16), 'b': bias}
    dims = dict(E=E, D=D, H=H, A=A, O=O, S=S, B=B)
    return prepped, dims


def decoder_forward(prev_y, prev_h, encoder_outputs, prepped, dims):
    """prev_y: (B,E), prev_h: (1,B,H), encoder_outputs: (S,B,D)."""
    S, B, D = encoder_outputs.shape
    E, H, A, O = dims['E'], dims['H'], dims['A'], dims['O']
    assert S == dims['S'] and B == dims['B']

    h2d = prev_h.reshape(B, H).astype(jnp.float32)     # prev_h_batch.view(-1, s_dim)
    # bf16 MXU operand; in an autoregressive decode loop hoist this cast out of the loop.
    enc2d = encoder_outputs.reshape(S * B, D).astype(jnp.bfloat16)

    vmem = pl.BlockSpec(memory_space=pltpu.MemorySpace.VMEM)
    out_slab = pl.pallas_call(
        partial(_decoder_fused_kernel, S=S, B=B, E=E, D=D, H=H, A=A, O=O),
        out_shape=jax.ShapeDtypeStruct((B, O + H + S), jnp.float32),
        in_specs=[vmem] * 5,
        out_specs=vmem,
        # NOTE: if the caller donates prev_h, input_output_aliases={2: 0}-style aliasing of
        # the hidden state can additionally drop one HBM allocation per decode step.
    )(enc2d, prev_y.astype(jnp.float32), h2d, prepped['W'], prepped['b'])

    dec_out = out_slab[:, :O]
    dec_hid = out_slab[:, O:O + H][None, :, :]   # GRU convention: (1, B, H)
    attw = out_slab[:, O + H:]
    return dec_out, dec_hid, attw


def decoder_forward_ref(prev_y, prev_h, enc, p):
    """Pure-JAX reference mirroring the PyTorch module (including the .view quirk)."""
    S, B, D = enc.shape
    H = prev_h.shape[2]
    A = p['U_w'].shape[0]
    h = prev_h.reshape(B, H)
    uh = (enc.reshape(S * B, D) @ p['U_w'].T + p['U_b']).reshape(S, B, A)
    wq = h @ p['W_w'].T + p['W_b']
    wquh = jnp.tanh(uh + wq[None, :, :])
    scores = (wquh.reshape(S * B, A) @ p['v_w'].T + p['v_b']).reshape(B, S)
    attw = jax.nn.softmax(scores, axis=1)
    ctx = jnp.einsum('bs,sbd->bd', attw, enc)
    x = jnp.concatenate([prev_y, ctx], axis=1) @ p['W_combine_w'].T + p['W_combine_b']
    gi = x @ p['gru_w_ih'].T + p['gru_b_ih']
    gh = h @ p['gru_w_hh'].T + p['gru_b_hh']
    r = jax.nn.sigmoid(gi[:, :H] + gh[:, :H])
    z = jax.nn.sigmoid(gi[:, H:2 * H] + gh[:, H:2 * H])
    n = jnp.tanh(gi[:, 2 * H:] + r * gh[:, 2 * H:])
    h_new = (1.0 - z) * n + z * h
    logits = h_new @ p['W_out_w'].T + p['W_out_b']
    return jax.nn.log_softmax(logits, axis=1), h_new[None, :, :], attw


def _uniform(key, shape, fan_in):
    bound = 1.0 / jnp.sqrt(jnp.float32(fan_in))
    return jax.random.uniform(key, shape, jnp.float32, -bound, bound)


def init_params(key, E, D, H, O):
    ks = jax.random.split(key, 14)
    A = H  # attention_dim defaults to decoder_dim
    return {
        # Attention
        'U_w': _uniform(ks[0], (A, D), D), 'U_b': _uniform(ks[1], (A,), D),
        'W_w': _uniform(ks[2], (A, H), H), 'W_b': _uniform(ks[3], (A,), H),
        'v_w': _uniform(ks[4], (1, A), A), 'v_b': _uniform(ks[5], (1,), A),
        # W_combine : Linear(E + D, H)
        'W_combine_w': _uniform(ks[6], (H, E + D), E + D),
        'W_combine_b': _uniform(ks[7], (H,), E + D),
        # GRU(input_size=H, hidden_size=H)
        'gru_w_ih': _uniform(ks[8], (3 * H, H), H),
        'gru_w_hh': _uniform(ks[9], (3 * H, H), H),
        'gru_b_ih': _uniform(ks[10], (3 * H,), H),
        'gru_b_hh': _uniform(ks[11], (3 * H,), H),
        # W_out : Linear(H, O)
        'W_out_w': _uniform(ks[12], (O, H), H),
        'W_out_b': _uniform(ks[13], (O,), H),
    }


if __name__ == "__main__":
    B, S = 2, 8
    E = 16      # embedding_dim
    D = 16      # encoder_hidden_size
    H = 32      # hidden_size (== GRU input_size; required by Decoder.forward)
    O = 24      # output_size

    root = jax.random.PRNGKey(0)
    kp, k1, k2, k3 = jax.random.split(root, 4)
    params = init_params(kp, E, D, H, O)
    prepped, dims = prepare_params(params, S, B)

    prev_y = jax.random.normal(k1, (B, E), jnp.float32)
    prev_h = jax.random.normal(k2, (1, B, H), jnp.float32)
    encoder_outputs = jax.random.normal(k3, (S, B, D), jnp.float32)

    dec_out, dec_hid, attw = jax.block_until_ready(
        decoder_forward(prev_y, prev_h, encoder_outputs, prepped, dims))

    # pure-JAX reference check (loose tolerance: MXU operands are bf16 with f32 accumulation
    # and W_combine is pre-composed; semantic/layout bugs would be O(0.1..1) off)
    ref_out, ref_hid, ref_attw = decoder_forward_ref(prev_y, prev_h, encoder_outputs, params)

    assert dec_out.shape == (B, O) and dec_hid.shape == (1, B, H) and attw.shape == (B, S)
    assert jnp.allclose(attw, ref_attw, atol=5e-2, rtol=5e-2)
    assert jnp.allclose(dec_hid, ref_hid, atol=5e-2, rtol=5e-2)
    assert jnp.allclose(dec_out, ref_out, atol=5e-2, rtol=5e-2)
    # structural checks: softmax rows sum to ~1 (approx-reciprocal denominator),
    # log_softmax exponentiates to a distribution
    assert jnp.allclose(jnp.sum(attw, axis=1), 1.0, atol=1e-2)
    assert jnp.allclose(jnp.sum(jnp.exp(dec_out), axis=1), 1.0, atol=1e-3)

    print("KERNEL_OK")
</pallas_src>

<mosaic_0001>
module attributes {stable_mosaic.version = 11 : i64} {
  func.func @_decoder_fused_kernel(%arg0: memref<16x16xbf16, #tpu.memory_space<vmem>>, %arg1: memref<2x16xf32, #tpu.memory_space<vmem>>, %arg2: memref<2x32xf32, #tpu.memory_space<vmem>>, %arg3: memref<144x128xbf16, #tpu.memory_space<vmem>>, %arg4: memref<5x128xf32, #tpu.memory_space<vmem>>, %arg5: memref<2x64xf32, #tpu.memory_space<vmem>>) attributes {dimension_semantics = [], scalar_prefetch = 0 : i64, scratch_operands = 0 : i64, tpu.core_type = #tpu.core_type<tc>} {
    %c0 = arith.constant 0 : index
    %c0_0 = arith.constant 0 : index
    %0 = vector.load %arg0[%c0, %c0_0] : memref<16x16xbf16, #tpu.memory_space<vmem>>, vector<16x16xbf16>
    %c0_1 = arith.constant 0 : index
    %c0_2 = arith.constant 0 : index
    %1 = vector.load %arg1[%c0_1, %c0_2] : memref<2x16xf32, #tpu.memory_space<vmem>>, vector<2x16xf32>
    %c0_3 = arith.constant 0 : index
    %c0_4 = arith.constant 0 : index
    %2 = vector.load %arg2[%c0_3, %c0_4] : memref<2x32xf32, #tpu.memory_space<vmem>>, vector<2x32xf32>
    %3 = arith.truncf %1 : vector<2x16xf32> to vector<2x16xbf16>
    %c48 = arith.constant 48 : index
    %c0_5 = arith.constant 0 : index
    %4 = vector.load %arg3[%c48, %c0_5] : memref<144x128xbf16, #tpu.memory_space<vmem>>, vector<16x96xbf16>
    %cst = arith.constant dense<0.000000e+00> : vector<2x96xf32>
    %5 = tpu.matmul %3, %4, %cst {dimension_numbers = #tpu.dot_dimension_numbers<[1], [0], [0], [1], [0, 0, 1, 1], [], []>} : vector<2x16xbf16>, vector<16x96xbf16>, vector<2x96xf32> -> vector<2x96xf32>
    %6 = arith.truncf %2 : vector<2x32xf32> to vector<2x32xbf16>
    %c16 = arith.constant 16 : index
    %c0_6 = arith.constant 0 : index
    %7 = vector.load %arg3[%c16, %c0_6] : memref<144x128xbf16, #tpu.memory_space<vmem>>, vector<32x128xbf16>
    %cst_7 = arith.constant dense<0.000000e+00> : vector<2x128xf32>
    %8 = tpu.matmul %6, %7, %cst_7 {dimension_numbers = #tpu.dot_dimension_numbers<[1], [0], [0], [1], [0, 0, 1, 1], [], []>} : vector<2x32xbf16>, vector<32x128xbf16>, vector<2x128xf32> -> vector<2x128xf32>
    %9 = vector.extract_strided_slice %8 {offsets = [0, 0], sizes = [2, 32], strides = [1, 1]} : vector<2x128xf32> to vector<2x32xf32>
    %10 = vector.extract_strided_slice %8 {offsets = [0, 32], sizes = [2, 96], strides = [1, 1]} : vector<2x128xf32> to vector<2x96xf32>
    %c3 = arith.constant 3 : index
    %c0_8 = arith.constant 0 : index
    %11 = vector.load %arg4[%c3, %c0_8] : memref<5x128xf32, #tpu.memory_space<vmem>>, vector<1x96xf32>
    %12 = vector.broadcast %11 : vector<1x96xf32> to vector<2x96xf32>
    %13 = arith.addf %10, %12 : vector<2x96xf32>
    %c0_9 = arith.constant 0 : index
    %c0_10 = arith.constant 0 : index
    %14 = vector.load %arg3[%c0_9, %c0_10] : memref<144x128xbf16, #tpu.memory_space<vmem>>, vector<16x32xbf16>
    %cst_11 = arith.constant dense<0.000000e+00> : vector<16x32xf32>
    %15 = tpu.matmul %0, %14, %cst_11 {dimension_numbers = #tpu.dot_dimension_numbers<[1], [0], [0], [1], [0, 0, 1, 1], [], []>} : vector<16x16xbf16>, vector<16x32xbf16>, vector<16x32xf32> -> vector<16x32xf32>
    %c112 = arith.constant 112 : index
    %c0_12 = arith.constant 0 : index
    %16 = vector.load %arg3[%c112, %c0_12] : memref<144x128xbf16, #tpu.memory_space<vmem>>, vector<16x2xbf16>
    %17 = arith.truncf %9 : vector<2x32xf32> to vector<2x32xbf16>
    %cst_13 = arith.constant dense<0.000000e+00> : vector<16x32xf32>
    %18 = tpu.matmul %16, %17, %cst_13 {dimension_numbers = #tpu.dot_dimension_numbers<[1], [0], [0], [1], [0, 0, 1, 1], [], []>} : vector<16x2xbf16>, vector<2x32xbf16>, vector<16x32xf32> -> vector<16x32xf32>
    %19 = arith.addf %15, %18 : vector<16x32xf32>
    %c0_14 = arith.constant 0 : index
    %c0_15 = arith.constant 0 : index
    %20 = vector.load %arg4[%c0_14, %c0_15] : memref<5x128xf32, #tpu.memory_space<vmem>>, vector<1x32xf32>
    %21 = vector.broadcast %20 : vector<1x32xf32> to vector<16x32xf32>
    %22 = arith.addf %19, %21 : vector<16x32xf32>
    %23 = math.tanh %22 : vector<16x32xf32>
    %c1 = arith.constant 1 : index
    %c0_16 = arith.constant 0 : index
    %24 = vector.load %arg4[%c1, %c0_16] : memref<5x128xf32, #tpu.memory_space<vmem>>, vector<1x32xf32>
    %cst_17 = arith.constant dense<0.000000e+00> : vector<1x16xf32>
    %25 = tpu.matmul %24, %23, %cst_17 {dimension_numbers = #tpu.dot_dimension_numbers<[1], [1], [0], [0], [0, 0, 1, 0], [], []>} : vector<1x32xf32>, vector<16x32xf32>, vector<1x16xf32> -> vector<1x16xf32>
    %26 = vector.extract_strided_slice %25 {offsets = [0, 0], sizes = [1, 8], strides = [1, 1]} : vector<1x16xf32> to vector<1x8xf32>
    %27 = vector.extract_strided_slice %25 {offsets = [0, 8], sizes = [1, 8], strides = [1, 1]} : vector<1x16xf32> to vector<1x8xf32>
    %28 = tpu.concatenate %26, %27 in 0 : vector<1x8xf32>, vector<1x8xf32> -> vector<2x8xf32>
    %cst_18 = arith.constant dense<0xFF800000> : vector<2xf32>
    %29 = vector.multi_reduction <maximumf>, %28, %cst_18 [1] : vector<2x8xf32> to vector<2xf32>
    %30 = vector.shape_cast %29 : vector<2xf32> to vector<2x1xf32>
    %31 = vector.broadcast %30 : vector<2x1xf32> to vector<2x8xf32>
    %32 = arith.subf %28, %31 : vector<2x8xf32>
    %33 = math.exp %32 : vector<2x8xf32>
    %cst_19 = arith.constant dense<0.000000e+00> : vector<2xf32>
    %34 = vector.multi_reduction <add>, %33, %cst_19 [1] : vector<2x8xf32> to vector<2xf32>
    %35 = vector.shape_cast %34 : vector<2xf32> to vector<2x1xf32>
    %36 = tpu.reciprocal %35 {approx = true} : vector<2x1xf32> -> vector<2x1xf32>
    %37 = vector.broadcast %36 : vector<2x1xf32> to vector<2x8xf32>
    %38 = arith.mulf %33, %37 : vector<2x8xf32>
    %39 = arith.truncf %38 : vector<2x8xf32> to vector<2x8xbf16>
    %c128 = arith.constant 128 : index
    %c0_20 = arith.constant 0 : index
    %40 = vector.load %arg3[%c128, %c0_20] : memref<144x128xbf16, #tpu.memory_space<vmem>>, vector<8x16xbf16>
    %cst_21 = arith.constant dense<0.000000e+00> : vector<2x16xf32>
    %41 = tpu.matmul %39, %40, %cst_21 {dimension_numbers = #tpu.dot_dimension_numbers<[1], [0], [0], [1], [0, 0, 1, 1], [], []>} : vector<2x8xbf16>, vector<8x16xbf16>, vector<2x16xf32> -> vector<2x16xf32>
    %c136 = arith.constant 136 : index
    %c0_22 = arith.constant 0 : index
    %42 = vector.load %arg3[%c136, %c0_22] : memref<144x128xbf16, #tpu.memory_space<vmem>>, vector<2x16xbf16>
    %43 = arith.extf %42 : vector<2x16xbf16> to vector<2x16xf32>
    %44 = arith.mulf %41, %43 : vector<2x16xf32>
    %45 = arith.truncf %44 : vector<2x16xf32> to vector<2x16xbf16>
    %cst_23 = arith.constant dense<0.000000e+00> : vector<2x16xf32>
    %46 = tpu.matmul %45, %0, %cst_23 {dimension_numbers = #tpu.dot_dimension_numbers<[1], [0], [0], [1], [0, 0, 1, 1], [], []>} : vector<2x16xbf16>, vector<16x16xbf16>, vector<2x16xf32> -> vector<2x16xf32>
    %47 = arith.truncf %46 : vector<2x16xf32> to vector<2x16xbf16>
    %c64 = arith.constant 64 : index
    %c0_24 = arith.constant 0 : index
    %48 = vector.load %arg3[%c64, %c0_24] : memref<144x128xbf16, #tpu.memory_space<vmem>>, vector<16x96xbf16>
    %cst_25 = arith.constant dense<0.000000e+00> : vector<2x96xf32>
    %49 = tpu.matmul %47, %48, %cst_25 {dimension_numbers = #tpu.dot_dimension_numbers<[1], [0], [0], [1], [0, 0, 1, 1], [], []>} : vector<2x16xbf16>, vector<16x96xbf16>, vector<2x96xf32> -> vector<2x96xf32>
    %50 = arith.addf %5, %49 : vector<2x96xf32>
    %c2 = arith.constant 2 : index
    %c0_26 = arith.constant 0 : index
    %51 = vector.load %arg4[%c2, %c0_26] : memref<5x128xf32, #tpu.memory_space<vmem>>, vector<1x96xf32>
    %52 = vector.broadcast %51 : vector<1x96xf32> to vector<2x96xf32>
    %53 = arith.addf %50, %52 : vector<2x96xf32>
    %54 = vector.extract_strided_slice %53 {offsets = [0, 0], sizes = [2, 32], strides = [1, 1]} : vector<2x96xf32> to vector<2x32xf32>
    %55 = vector.extract_strided_slice %13 {offsets = [0, 0], sizes = [2, 32], strides = [1, 1]} : vector<2x96xf32> to vector<2x32xf32>
    %56 = arith.addf %54, %55 : vector<2x32xf32>
    %57 = arith.negf %56 : vector<2x32xf32>
    %58 = math.exp %57 : vector<2x32xf32>
    %cst_27 = arith.constant 1.000000e+00 : f32
    %59 = vector.broadcast %cst_27 : f32 to vector<2x32xf32>
    %60 = arith.addf %59, %58 : vector<2x32xf32>
    %61 = arith.divf %59, %60 : vector<2x32xf32>
    %62 = vector.extract_strided_slice %53 {offsets = [0, 32], sizes = [2, 32], strides = [1, 1]} : vector<2x96xf32> to vector<2x32xf32>
    %63 = vector.extract_strided_slice %13 {offsets = [0, 32], sizes = [2, 32], strides = [1, 1]} : vector<2x96xf32> to vector<2x32xf32>
    %64 = arith.addf %62, %63 : vector<2x32xf32>
    %65 = arith.negf %64 : vector<2x32xf32>
    %66 = math.exp %65 : vector<2x32xf32>
    %cst_28 = arith.constant 1.000000e+00 : f32
    %67 = vector.broadcast %cst_28 : f32 to vector<2x32xf32>
    %68 = arith.addf %67, %66 : vector<2x32xf32>
    %69 = arith.divf %67, %68 : vector<2x32xf32>
    %70 = vector.extract_strided_slice %53 {offsets = [0, 64], sizes = [2, 32], strides = [1, 1]} : vector<2x96xf32> to vector<2x32xf32>
    %71 = vector.extract_strided_slice %13 {offsets = [0, 64], sizes = [2, 32], strides = [1, 1]} : vector<2x96xf32> to vector<2x32xf32>
    %72 = arith.mulf %61, %71 : vector<2x32xf32>
    %73 = arith.addf %70, %72 : vector<2x32xf32>
    %74 = math.tanh %73 : vector<2x32xf32>
    %cst_29 = arith.constant 1.000000e+00 : f32
    %75 = vector.broadcast %cst_29 : f32 to vector<2x32xf32>
    %76 = arith.subf %75, %69 : vector<2x32xf32>
    %77 = arith.mulf %76, %74 : vector<2x32xf32>
    %78 = arith.mulf %69, %2 : vector<2x32xf32>
    %79 = arith.addf %77, %78 : vector<2x32xf32>
    %80 = arith.truncf %79 : vector<2x32xf32> to vector<2x32xbf16>
    %c80 = arith.constant 80 : index
    %c0_30 = arith.constant 0 : index
    %81 = vector.load %arg3[%c80, %c0_30] : memref<144x128xbf16, #tpu.memory_space<vmem>>, vector<32x24xbf16>
    %cst_31 = arith.constant dense<0.000000e+00> : vector<2x24xf32>
    %82 = tpu.matmul %80, %81, %cst_31 {dimension_numbers = #tpu.dot_dimension_numbers<[1], [0], [0], [1], [0, 0, 1, 1], [], []>} : vector<2x32xbf16>, vector<32x24xbf16>, vector<2x24xf32> -> vector<2x24xf32>
    %c4 = arith.constant 4 : index
    %c0_32 = arith.constant 0 : index
    %83 = vector.load %arg4[%c4, %c0_32] : memref<5x128xf32, #tpu.memory_space<vmem>>, vector<1x24xf32>
    %84 = vector.broadcast %83 : vector<1x24xf32> to vector<2x24xf32>
    %85 = arith.addf %82, %84 : vector<2x24xf32>
    %cst_33 = arith.constant dense<0xFF800000> : vector<2xf32>
    %86 = vector.multi_reduction <maximumf>, %85, %cst_33 [1] : vector<2x24xf32> to vector<2xf32>
    %87 = vector.shape_cast %86 : vector<2xf32> to vector<2x1xf32>
    %88 = vector.broadcast %87 : vector<2x1xf32> to vector<2x24xf32>
    %89 = arith.subf %85, %88 : vector<2x24xf32>
    %90 = math.exp %89 : vector<2x24xf32>
    %cst_34 = arith.constant dense<0.000000e+00> : vector<2xf32>
    %91 = vector.multi_reduction <add>, %90, %cst_34 [1] : vector<2x24xf32> to vector<2xf32>
    %92 = vector.shape_cast %91 : vector<2xf32> to vector<2x1xf32>
    %93 = math.log %92 : vector<2x1xf32>
    %94 = arith.addf %93, %87 : vector<2x1xf32>
    %95 = vector.broadcast %94 : vector<2x1xf32> to vector<2x24xf32>
    %96 = arith.subf %85, %95 : vector<2x24xf32>
    %97 = tpu.concatenate %96, %79, %38 in 1 : vector<2x24xf32>, vector<2x32xf32>, vector<2x8xf32> -> vector<2x64xf32>
    %c0_35 = arith.constant 0 : index
    %c0_36 = arith.constant 0 : index
    %98 = vector.load %arg5[%c0_35, %c0_36] : memref<2x64xf32, #tpu.memory_space<vmem>>, vector<2x64xf32>
    tpu.vector_store %arg5[%c0_35, %c0_36], %97 {strides = array<i32>} : memref<2x64xf32, #tpu.memory_space<vmem>>, vector<2x64xf32>,
    return
  }
}

</mosaic_0001>

<bundles_post_ra>
// kernel: tpu_custom_call.1
= control target key start
LH: loop header
LB: loop body
LE: loop exit
PB: predicated region body
PF: predicated region fallthrough
CT: control target
= control target key end

     0   :  { %10 = vsyncpa [#allocation3], 0  ;;  %s1083_s0 = inlined_call_operand.hbm [shape: bf16[16,16], index: 0, kind: input, shape index: {}]   ;;  %s1084_s1 = inlined_call_operand.vmem [shape: f32[2,16], index: 1, kind: input, shape index: {}]   ;;  %s1085_s2 = inlined_call_operand.vmem [shape: f32[2,32], index: 2, kind: input, shape index: {}]   ;;  %s1086_s3 = inlined_call_operand.hbm [shape: bf16[144,128], index: 3, kind: input, shape index: {}]   ;;  %s1087_s4 = inlined_call_operand.vmem [shape: f32[5,128], index: 4, kind: input, shape index: {}]   ;;  %s1088_s5 = inlined_call_operand.hbm [shape: f32[2,64], index: 5, kind: output, shape index: {}]  }
   0x1   :  { %11 = vsyncpa [#allocation6], 0 }
   0x2   :  { %12 = vsyncpa [#allocation4], 0  ;;  %s920_s18 = smov [#allocation2]   ;;  %s848_s22 = scalar_lea.hbm %s1083_s0, 128 }
   0x3   :  { %s18_s19 = sshll.u32 %s920_s18, 4  ;;  %p849_p0 = scmp.ne.s32.totalorder %s1083_s0, %s848_s22  ;;  %s19_s19 = int_to_ptr.vmem [resolvable:$true] %s18_s19 }
   0x4   :  { %p852_p1 = scmp.lt.u32.totalorder %s848_s22, %s1083_s0 }
   0x6   :  { %p854_p2 = pnand %p852_p1, %p849_p0 }
   0x8   :  { %857 = shalt.err (!%p854_p2)
}
   0x9   :  { %s858_s27 = scalar_lea.vmem %s19_s19, 128  ;;  %p863_p4 = scmp.lt.s32.totalorder %s19_s19, %s19_s19 }
   0xa   :  { %p859_p3 = scmp.ne.s32.totalorder %s19_s19, %s858_s27  ;;  %p864_p5 = scmp.lt.s32.totalorder %s858_s27, %s858_s27 }
   0xc   :  { %p865_p6 = por %p864_p5, %p863_p4 }
   0xe   :  { %p866_p7 = pnand %p865_p6, %p859_p3 }
  0x10   :  { %869 = shalt.err (!%p866_p7)
}
  0x11   :  { %s921_s28 = smov 64   ;;  %s922_s29 = smov 4  }
  0x12   :  { %24 = dma.hbm_to_vmem [thread:$0]  %s1083_s0, 128, %s19_s19, [#allocation3], %s921_s28, %s921_s28, %s922_s29  }
  0x13   :  { %s923_s7 = smov [#allocation5]   ;;  %s870_s11 = scalar_lea.hbm %s1086_s3, 1152 }
  0x14   :  { %s34_s8 = sshll.u32 %s923_s7, 4  ;;  %p871_p8 = scmp.ne.s32.totalorder %s1086_s3, %s870_s11  ;;  %s35_s8 = int_to_ptr.vmem [resolvable:$true] %s34_s8 }
  0x15   :  { %p874_p9 = scmp.lt.u32.totalorder %s870_s11, %s1086_s3 }
  0x17   :  { %p876_p10 = pnand %p874_p9, %p871_p8 }
  0x19   :  { %879 = shalt.err (!%p876_p10)
}
  0x1a   :  { %s880_s16 = scalar_lea.vmem %s35_s8, 1152  ;;  %p885_p12 = scmp.lt.s32.totalorder %s35_s8, %s35_s8 }
  0x1b   :  { %p881_p11 = scmp.ne.s32.totalorder %s35_s8, %s880_s16  ;;  %p886_p13 = scmp.lt.s32.totalorder %s880_s16, %s880_s16 }
  0x1d   :  { %p887_p0 = por %p886_p13, %p885_p12 }
  0x1f   :  { %p888_p1 = pnand %p887_p0, %p881_p11 }
  0x21   :  { %891 = shalt.err (!%p888_p1)
}
  0x22   :  { %40 = dma.hbm_to_vmem [thread:$0]  %s1086_s3, 1152, %s35_s8, [#allocation6], %s921_s28, %s921_s28, %s922_s29  }
  0x23   :  { %914 = dma.done.wait [#allocation3], 128  }
  0x24   :  { %915 = vsyncadd [#allocation3], 4294967168 }
  0x25   :  { %916 = dma.done.wait [#allocation6], 1152  }
  0x26   :  { %917 = vsyncadd [#allocation6], 4294966144  ;;  %v924_v0 = vmov 0.0   ;;  %vm925_vm0 = vmmov 0   ;;  %v821_v1 = vld [vmem:[#allocation5 + $0x8] sm:$0xff]   ;;  %v822_v2 = vld [vmem:[#allocation5 + $0x10] sm:$0xff]  }
  0x27   :  { %746 = vmatprep.subr.bf16.mxu0 %v924_v0  ;;  %750 = vmatprep.mubr.msk.bf16.mxu0 %vm925_vm0, %v924_v0  ;;  %vm74_vm1 = vcmask 261120   ;;  %v999_v3 = vld [vmem:[%s1085_s2] sm:$0x3]  ;;  %vm142_vm2 = vcmask 1040384   ;;  %vm138_vm3 = vcmask 15360   ;;  %v824_v12 = vld [vmem:[#allocation5] sm:$0xff]  }
  0x28   :  { %754 = vmatprep.subr.bf16.mxu1 %v924_v0  ;;  %756 = vmatprep.mubr.msk.bf16.mxu1 %vm925_vm0, %v924_v0  ;;  %v57_v4 = vpack.c.bf16 %v999_v3, %v999_v3  ;;  %v823_v11 = vld [vmem:[#allocation5 + $0x38] sm:$0xff]   ;;  %vm198_vm4 = vcmask 130048   ;;  %v926_v14 = vmov 0.0|0.0   ;;  %vm807_vm5 = vmpackc.low %vm74_vm1, %vm74_vm1  ;;  %s927_s22 = smov 120   ;;  %vm338_vm6 = vcmask 58368   ;;  %s928_s23 = smov 32  }
  0x29   :  { %747 = vmatpush3.bf16.msra.mxu0 %v821_v1  ;;  %v825_v13 = vld [vmem:[#allocation2] sm:$0xff]   ;;  %v351_v44 = vld [vmem:[#allocation5 + $0x40] sm:$0xf]  ;;  %vm356_vm7 = vcmask 1043456   ;;  %s929_s26 = smov 96   ;;  %vm352_vm8 = vcmask 64512  }
  0x2a   :  { %748 = vmatprep.subr.bf16.mxu0 %v924_v0  ;;  %v709_v20 = vld [vmem:[%s1087_s4] ss:$0 sm:$0xff]  ;;  %v252_v31 = vld [vmem:[%s1087_s4 + $0x1] sm:$0x1]  ;;  %v703_v43 = vld [vmem:[%s1087_s4 + $0x3] ss:$0 sm:$0xff] }
  0x2b   :  { %v358_v45 = vsel %vm356_vm7, %v351_v44, 0  ;;  %v826_v52 = vld [vmem:[#allocation5 + $0x20] sm:$0xff]   ;;  %v827_v59 = vld [vmem:[#allocation5 + $0x18] sm:$0xff]   ;;  %vm656_vm9 = vcmask 189440   ;;  %s930_s7 = smov 56   ;;  %vm678_vm10 = vcmask 195584  }
  0x2c   :  { %v400_v53 = vld [vmem:[#allocation5 + $0x44] sm:$0x1]  ;;  %v52_v62 = vld [vmem:[%s1084_s1] sm:$0x3]  ;;  %vm680_vm11 = vcmask 457728   ;;  %vm682_vm12 = vcmask 517120  }
  0x2d   :  { %749 = vmatpush3.bf16.msra.mxu0 %v822_v2  ;;  %v401_v54 = vunpack.c.l.bf16 %v400_v53  ;;  %v54_v63 = vpack.c.bf16 %v52_v62, %v52_v62 }
  0x2e   :  { %773 = vmatprep.subr.bf16.mxu0 %v924_v0 }
  0x30   :  { %751 = vmatmul.mubr.msk.bf16.vlgmr.msra.gmra.mrb[0].mxu0 %vm74_vm1, %v57_v4 }
  0x31   :  { %775 = vmatprep.mubr.msk.bf16.mxu0 %vm925_vm0, %v924_v0  ;;  %774 = vmatpush3.bf16.msra.mxu0 %v358_v45 }
  0x32   :  { %785 = vmatprep.subr.bf16.mxu0 %v924_v0 }
 0x103   :  { %v1008_v5 = vpop.f32.mrb[0].mxu0 }
 0x104   :  { %v132_v6 = vpack.c.bf16 %v1008_v5, %v1008_v5  ;;  %v752_v7 = vpop.f32.mrb[1].mxu0 }
 0x105   :  { %v115_v8 = vpop.f32.mrb[2].mxu0 }
 0x106   :  { %v753_v9 = vpop.f32.mrb[3].mxu0  ;;  %v144_v10 = vsel %vm142_vm2, %v132_v6, 0 }
 0x107   :  { %755 = vmatpush3.bf16.msra.mxu1 %v144_v10 }
 0x108   :  { %760 = vmatprep.subr.bf16.mxu1 %v924_v0 }
 0x10a   :  { %757 = vmatmul.mubr.msk.bf16.vlgmr.msra.gmra.mrb[0].mxu1 %vm138_vm3, %v823_v11  ;;  %v719_v11 = vld [vmem:[%s1087_s4 + $0x2] ss:$0 sm:$0xff] }
 0x10b   :  { %761 = vmatpush3.bf16.msra.mxu1 %v824_v12  ;;  %762 = vmatprep.mubr.msk.bf16.mxu1 %vm925_vm0, %v924_v0 }
 0x10c   :  { %805 = vmatprep.subr.bf16.mxu1 %v926_v14 }
 0x112   :  { %763 = vmatmul.mubr.msk.bf16.vlgmr.msra.gmra.mrb[4].mxu1 %vm198_vm4, %v825_v13 }
 0x113   :  { %770 = vmatprep.mubr.msk.f32.mxu1 %vm925_vm0, %v924_v0 }
 0x1dd   :  { %v180_v15 = vpop.f32.mrb[0].mxu1 }
 0x1de   :  { %v758_v16 = vpop.f32.mrb[1].mxu1 }
 0x1df   :  { %v183_v17 = vpop.f32.mrb[2].mxu1 }
 0x1e0   :  { %v759_v18 = vpop.f32.mrb[3].mxu1 }
 0x1e5   :  { %v236_v19 = vpop.f32.mrb[4].mxu1 }
 0x1e6   :  { %v237_v21 = vadd.f32 %v236_v19, %v180_v15  ;;  %v764_v22 = vpop.f32.mrb[5].mxu1 }
 0x1e7   :  { %v239_v23 = vpop.f32.mrb[6].mxu1 }
 0x1e8   :  { %v248_v24 = vadd.f32 %v709_v20, %v237_v21  ;;  %v240_v25 = vadd.f32 %v239_v23, %v183_v17  ;;  %v765_v26 = vpop.f32.mrb[7].mxu1 }
 0x1ea   :  { %v249_v27 = vadd.f32 %v709_v20, %v240_v25  ;;  %830 = vtanh.f32 %v248_v24 }
 0x1ec   :  { %832 = vtanh.f32 %v249_v27  ;;  %v828_v27 = vld [vmem:[#allocation5 + $0x28] sm:$0xff]  }
 0x1f4   :  { %v831_v28 = vpop.eup %830 }
 0x1f6   :  { %v833_v29 = vpop.eup %832 }
 0x1f7   :  { %v806_v30 = vpack.c.bf16 %v833_v29, %v831_v28  ;;  %v829_v28 = vld [vmem:[#allocation5 + $0x30] sm:$0xff]  }
 0x1f9   :  { %808 = vmatpush3.bf16.xpose.msk.msra.mxu1 %vm807_vm5, %v806_v30 }
 0x1fa   :  { %779 = vmatprep.subr.bf16.mxu1 %v924_v0 }
 0x200   :  { %771 = vmatmul.mubr.msk.f32.vlgmr.msra.gmra.mrb[8].mxu1 %vm74_vm1, %v252_v31 }
 0x201   :  { %780 = vmatpush3.bf16.msra.mxu1 %v825_v13  ;;  %781 = vmatprep.mubr.msk.bf16.mxu1 %vm925_vm0, %v924_v0 }
 0x202   :  { %791 = vmatprep.subr.bf16.mxu1 %v924_v0 }
 0x2d3   :  { %v328_v32 = vpop.f32.mrb[8].mxu1 }
 0x2d4   :  { %v772_v33 = vpop.f32.mrb[9].mxu1  ;;  %v333_v34 = vrot.slane %v328_v32, 7 }
 0x2d6   :  { %334 = vrot.lane.b32.xlu0 %v333_v34, %s927_s22 }
 0x348   :  { %v335_v35 = vpop.permute.xlu0 %334 }
 0x349   :  { %v337_v36 = vsel %vm142_vm2, %v328_v32, %v335_v35 }
 0x34a   :  { %v339_v37 = vsel %vm338_vm6, %v337_v36, -inf }
 0x34b   :  { %340 = vmax.xlane.f32.xlu0 %v339_v37 }
 0x361   :  { %583 = vrot.lane.b32.xlu0 %v999_v3, %s928_s23 }
 0x3d8   :  { %v341_v38 = vpop.xlane.xlu0 %340 }
 0x3d9   :  { %v342_v39 = vsub.f32 %v337_v36, %v341_v38 }
 0x3db   :  { %v343_v40 = vmul.f32 1.442695, %v342_v39 }
 0x3dc   :  { %v584_v30 = vpop.permute.xlu0 %583 }
 0x3dd   :  { %834 = vpow2.f32 %v343_v40 }
 0x3e7   :  { %v835_v41 = vpop.eup %834 }
 0x3e8   :  { %v345_v42 = vsel %vm338_vm6, %v835_v41, 0.0 }
 0x3e9   :  { %346 = vadd.xlane.f32.xlu1 %v345_v42 }
 0x3fa   :  { %124 = vrot.lane.b32.xlu1 %v703_v43, %s928_s23 }
 0x476   :  { %v347_v46 = vpop.xlane.xlu1 %346 }
 0x477   :  { %836 = vrcp.f32 %v347_v46 }
 0x47a   :  { %v125_v47 = vpop.permute.xlu1 %124 }
 0x47b   :  { %v127_v48 = vadd.f32 %v125_v47, %v1008_v5 }
 0x47d   :  { %556 = vrot.lane.b32.xlu1 %v127_v48, %s929_s26 }
 0x481   :  { %v837_v49 = vpop.eup %836  ;;  %566 = vrot.lane.b32.xlu1 %v127_v48, %s928_s23 }
 0x482   :  { %v1041_v50 = vmul.f32 %v837_v49, %v835_v41 }
 0x484   :  { %v350_v51 = vpack.c.bf16 %v1041_v50, %v1041_v50 }
 0x486   :  { %776 = vmatmul.mubr.msk.bf16.vlgmr.msra.gmra.mrb[4].mxu0 %vm352_vm8, %v350_v51 }
 0x487   :  { %787 = vmatprep.mubr.msk.bf16.mxu0 %vm925_vm0, %v924_v0  ;;  %786 = vmatpush3.bf16.msra.mxu0 %v826_v52 }
 0x488   :  { %797 = vmatprep.subr.bf16.mxu0 %v924_v0 }
 0x4ef   :  { %v557_v17 = vpop.permute.xlu1 %556 }
 0x4f3   :  { %v567_v23 = vpop.permute.xlu1 %566 }
 0x559   :  { %v394_v55 = vpop.f32.mrb[4].mxu0 }
 0x55a   :  { %v402_v56 = vmul.f32 %v401_v54, %v394_v55  ;;  %v777_v57 = vpop.f32.mrb[5].mxu0 }
 0x55b   :  { %v397_v58 = vpop.f32.mrb[6].mxu0 }
 0x55c   :  { %v403_v60 = vpack.c.bf16 %v402_v56, %v402_v56  ;;  %v778_v61 = vpop.f32.mrb[7].mxu0 }
 0x55e   :  { %782 = vmatmul.mubr.msk.bf16.vlgmr.msra.gmra.mrb[12].mxu1 %vm198_vm4, %v403_v60 }
 0x55f   :  { %792 = vmatpush3.bf16.msra.mxu1 %v827_v59  ;;  %793 = vmatprep.mubr.msk.bf16.mxu1 %vm925_vm0, %v924_v0 }
 0x566   :  { %794 = vmatmul.mubr.msk.bf16.vlgmr.msra.gmra.mrb[16].mxu1 %vm198_vm4, %v54_v63 }
 0x631   :  { %v442_v1 = vpop.f32.mrb[12].mxu1 }
 0x632   :  { %v448_v2 = vpack.c.bf16 %v442_v1, %v442_v1  ;;  %v783_v3 = vpop.f32.mrb[13].mxu1 }
 0x633   :  { %v445_v4 = vpop.f32.mrb[14].mxu1 }
 0x634   :  { %v784_v5 = vpop.f32.mrb[15].mxu1  ;;  %788 = vmatmul.mubr.msk.bf16.vlgmr.msra.gmra.mrb[8].mxu0 %vm198_vm4, %v448_v2 }
 0x635   :  { %801 = vmatprep.mubr.msk.bf16.mxu0 %vm925_vm0, %v924_v0  ;;  %798 = vmatpush3.bf16.msra.mxu0 %v828_v27 }
 0x636   :  { %799 = vmatprep.subr.bf16.mxu0 %v924_v0  ;;  %v721_v0 = vld [vmem:[%s1087_s4 + $0x4] ss:$0 sm:$0xff]  ;;  %s931_s4 = smov [#allocation7]  }
 0x637   :  { %s690_s8 = sshll.u32 %s931_s4, 4  ;;  %s691_s8 = int_to_ptr.vmem [resolvable:$true] %s690_s8 }
 0x638   :  { %s892_s9 = scalar_lea.vmem %s691_s8, 32  ;;  %p897_p3 = scmp.lt.s32.totalorder %s691_s8, %s691_s8 }
 0x639   :  { %v543_v6 = vpop.f32.mrb[16].mxu1  ;;  %800 = vmatpush3.bf16.msra.mxu0 %v829_v28  ;;  %p893_p2 = scmp.ne.s32.totalorder %s691_s8, %s892_s9  ;;  %p898_p4 = scmp.lt.s32.totalorder %s892_s9, %s892_s9 }
 0x63a   :  { %v795_v7 = vpop.f32.mrb[17].mxu1 }
 0x63b   :  { %v546_v8 = vpop.f32.mrb[18].mxu1  ;;  %p899_p5 = por %p898_p4, %p897_p3 }
 0x63c   :  { %v796_v9 = vpop.f32.mrb[19].mxu1 }
 0x63d   :  { %p900_p6 = pnand %p899_p5, %p893_p2 }
 0x707   :  { %v494_v10 = vpop.f32.mrb[8].mxu0 }
 0x708   :  { %v544_v12 = vadd.f32 %v543_v6, %v494_v10  ;;  %v789_v13 = vpop.f32.mrb[9].mxu0 }
 0x709   :  { %v497_v14 = vpop.f32.mrb[10].mxu0 }
 0x70a   :  { %v554_v15 = vadd.f32 %v719_v11, %v544_v12  ;;  %v790_v16 = vpop.f32.mrb[11].mxu0 }
 0x70c   :  { %v559_v18 = vadd.f32 %v557_v17, %v554_v15 }
 0x70e   :  { %v720_v19 = vmul.f32 -1.442695, %v559_v18 }
 0x710   :  { %838 = vpow2.f32 %v720_v19 }
 0x71a   :  { %v839_v20 = vpop.eup %838 }
 0x71b   :  { %v563_v21 = vadd.f32 1.0, %v839_v20 }
 0x71d   :  { %840 = vrcp.f32 %v563_v21 }
 0x727   :  { %v841_v22 = vpop.eup %840 }
 0x728   :  { %v569_v24 = vmul.f32 %v841_v22, %v567_v23  ;;  %v576_v31 = vsub.f32 1.0, %v841_v22  ;;  %v586_v33 = vmul.f32 %v841_v22, %v584_v30 }
 0x72a   :  { %571 = vrot.lane.b32.xlu1 %v569_v24, %s921_s28 }
 0x79c   :  { %v572_v25 = vpop.permute.xlu1 %571 }
 0x79d   :  { %v574_v26 = vadd.f32 %v572_v25, %v554_v15 }
 0x79f   :  { %842 = vtanh.f32 %v574_v26 }
 0x7a9   :  { %v843_v29 = vpop.eup %842 }
 0x7aa   :  { %578 = vrot.lane.b32.xlu1 %v843_v29, %s929_s26 }
 0x81c   :  { %v579_v32 = vpop.permute.xlu1 %578 }
 0x81d   :  { %v581_v34 = vmul.f32 %v579_v32, %v576_v31 }
 0x81f   :  { %v587_v35 = vadd.f32 %v586_v33, %v581_v34 }
 0x821   :  { %v588_v36 = vpack.c.bf16 %v587_v35, %v587_v35 }
 0x823   :  { %599 = vrot.lane.b32.xlu1 %v588_v36, %s929_s26 }
 0x895   :  { %v600_v37 = vpop.permute.xlu1 %599 }
 0x896   :  { %802 = vmatmul.mubr.msk.bf16.vlgmr.msra.gmra.mrb[12].mxu0 %vm74_vm1, %v600_v37 }
 0x969   :  { %v650_v38 = vpop.f32.mrb[12].mxu0 }
 0x96a   :  { %v651_v39 = vadd.f32 %v721_v0, %v650_v38  ;;  %v803_v40 = vpop.f32.mrb[13].mxu0 }
 0x96b   :  { %v653_v41 = vpop.f32.mrb[14].mxu0 }
 0x96c   :  { %v804_v42 = vpop.f32.mrb[15].mxu0  ;;  %v657_v43 = vsel %vm656_vm9, %v651_v39, -inf }
 0x96d   :  { %658 = vmax.xlane.f32.xlu1 %v657_v43 }
 0x97e   :  { %671 = vrot.lane.b32.xlu1 %v587_v35, %s927_s22 }
 0x9fa   :  { %v659_v44 = vpop.xlane.xlu1 %658 }
 0x9fb   :  { %v660_v45 = vsub.f32 %v651_v39, %v659_v44 }
 0x9fd   :  { %v661_v46 = vmul.f32 1.442695, %v660_v45 }
 0x9fe   :  { %v672_v55 = vpop.permute.xlu1 %671 }
 0x9ff   :  { %844 = vpow2.f32 %v661_v46 }
 0xa09   :  { %v845_v47 = vpop.eup %844 }
 0xa0a   :  { %v663_v48 = vsel %vm656_vm9, %v845_v47, 0.0 }
 0xa0b   :  { %664 = vadd.xlane.f32.xlu0 %v663_v48 }
 0xa21   :  { %675 = vrot.lane.b32.xlu0 %v1041_v50, %s930_s7 }
 0xa98   :  { %v665_v49 = vpop.xlane.xlu0 %664 }
 0xa99   :  { %846 = vlog2.f32 %v665_v49 }
 0xa9c   :  { %v676_v56 = vpop.permute.xlu0 %675 }
 0xaa3   :  { %v847_v51 = vpop.eup %846 }
 0xaa4   :  { %v667_v52 = vmul.f32 0.6931472, %v847_v51 }
 0xaa6   :  { %v668_v53 = vadd.f32 %v667_v52, %v659_v44 }
 0xaa8   :  { %v669_v54 = vsub.f32 %v651_v39, %v668_v53 }
 0xaaa   :  { %v679_v57 = vsel %vm678_vm10, %v669_v54, %v672_v55 }
 0xaab   :  { %v681_v58 = vsel %vm680_vm11, %v679_v57, %v676_v56 }
 0xaac   :  { %683 = vst.msk [vmem:[#allocation7] sm:$0x3] %vm682_vm12, %v681_v58 }
 0xaad   :  { %903 = shalt.err (!%p900_p6)
}
 0xaae   :  { %s904_s12 = scalar_lea.hbm %s1088_s5, 32 }
 0xaaf   :  { %p905_p7 = scmp.ne.s32.totalorder %s1088_s5, %s904_s12  ;;  %p908_p8 = scmp.lt.u32.totalorder %s904_s12, %s1088_s5 }
 0xab1   :  { %p910_p9 = pnand %p908_p8, %p905_p7 }
 0xab3   :  { %913 = shalt.err (!%p910_p9)
}
 0xab4   :  { %693 = dma.vmem_to_hbm [thread:$0]  %s691_s8, 32, %s1088_s5, [#allocation4]  }
 0xab5   :  { %918 = dma.done.wait [#allocation4], 32  }
 0xab6   :  { %919 = vsyncadd [#allocation4], 4294967264 }
 0xab7   :  { %697 = vsyncpa [#allocation3], 1 }
 0xab8   :  { %698 = vsyncpa [#allocation6], 1 }
 0xab9   :  { %699 = vsyncpa [#allocation4], 1 }

</bundles_post_ra>
